<compile_context>
chip_gen: v6e
topology: v6e:2x2x1
jax: 0.10.0
libtpu: 0.0.40
codegen_flags: <defaults>
</compile_context>

<pallas_src>
import math

import jax
import jax.numpy as jnp
from jax.experimental import pallas as pl
from jax.experimental.pallas import tpu as pltpu


def bdc_kernel(exp_t_ref, x_ref, o_ref):
    x = x_ref[...]                                   # (block_b, dim, M) float32
    exp_t = exp_t_ref[0]                             # scalar exp(temperature), SMEM

    # Batched Gram matrix: xp[b] = x[b] @ x[b]^T  (MXU, f32 accumulation).
    xp = jnp.einsum("bdm,bem->bde", x, x, preferred_element_type=jnp.float32)

    # diag(xp) == squared row norms: two cheap lane reductions over M replace
    # the eye-mask (iota, compare, full multiply, full-matrix reductions).
    xsq = x * x
    sq_col = jnp.sum(xsq, axis=2, keepdims=True)     # (block_b, dim, 1)  -> d_i
    sq_row = jnp.sum(xsq, axis=2)[:, None, :]        # (block_b, 1, dim)  -> d_j

    # dcov[b, i, j] = d_i + d_j - 2 * xp[b, i, j]
    dcov = sq_col + sq_row - 2.0 * xp
    dcov = jnp.maximum(dcov, 0.0001)                 # torch.clamp(min=1e-4)
    dcov = jnp.sqrt(exp_t * dcov + 1e-5)

    # Double centering.  dcov is symmetric, so the column means equal the row
    # means: two lane reductions (no cross-sublane reduce, no full-matrix mean).
    row_mean = jnp.mean(dcov, axis=2, keepdims=True)         # (block_b, dim, 1)
    col_mean = jnp.mean(dcov, axis=2)[:, None, :]            # (block_b, 1, dim)
    total_mean = jnp.mean(row_mean, axis=1, keepdims=True)   # (block_b, 1, 1)

    o_ref[...] = dcov - row_mean - col_mean + total_mean


def _choose_block_b(B, dim, M, budget_bytes=12 * 1024 * 1024):
    """Batch elements per grid step.

    Per-batch f32 VMEM footprint: double-buffered input tile (dim*M), double-
    buffered output tile (dim*dim), plus ~4x dim*dim of in-kernel intermediates
    (xp, dcov, result).  A 12 MiB budget stays under every chip's default
    scoped VMEM (16 MiB v5e, 32 MiB v6e/v7x) with headroom; vmem_limit_bytes is
    raised anyway for safety.  Also capped at B//2 so the grid keeps >=2 steps
    (both v7x TensorCores are used via the "parallel" batch axis).
    """
    per_b = 4 * (2 * dim * M + 6 * dim * dim)
    max_bt = max(1, budget_bytes // per_b)
    if B >= 2:
        max_bt = min(max_bt, B // 2)
    max_bt = int(max(1, min(max_bt, B)))
    for cand in range(max_bt, 0, -1):                # largest divisor of B <= max_bt
        if B % cand == 0:
            return cand
    return 1


def bdc_forward(x, temperature, block_b=None):
    """x: (B, dim, M) float32; temperature: (1, 1) float32 (log-space)."""
    B, dim, M = x.shape
    x = x.astype(jnp.float32)
    # exp(t) precomputed once; passed as a true scalar via scalar prefetch (SMEM).
    exp_t = jnp.exp(jnp.reshape(temperature, (-1,))[:1].astype(jnp.float32))  # (1,)

    if block_b is None:
        block_b = _choose_block_b(B, dim, M)
    nb = B // block_b

    out = pl.pallas_call(
        bdc_kernel,
        out_shape=jax.ShapeDtypeStruct((B, dim, dim), jnp.float32),
        grid_spec=pltpu.PrefetchScalarGridSpec(
            num_scalar_prefetch=1,                    # exp_t lands in SMEM
            grid=(nb,),
            in_specs=[
                # block_b batch elements per step, full (dim, M) trailing block
                pl.BlockSpec((block_b, dim, M), lambda b, exp_t_ref: (b, 0, 0)),
            ],
            out_specs=pl.BlockSpec((block_b, dim, dim),
                                   lambda b, exp_t_ref: (b, 0, 0)),
        ),
        compiler_params=pltpu.CompilerParams(
            dimension_semantics=("parallel",),
            vmem_limit_bytes=48 * 1024 * 1024,
        ),
    )(exp_t, x)
    return out.reshape(B, dim * dim)


def bdc_reference(x, t):
    """Pure-JAX transliteration of the PyTorch BDCovpool, for verification."""
    B, dim, M = x.shape
    I = jnp.eye(dim, dtype=x.dtype)[None].repeat(B, axis=0)
    I_M = jnp.ones((B, dim, dim), dtype=x.dtype)
    xp = jnp.einsum("bdm,bem->bde", x, x)
    dI = xp * I
    dcov = (jnp.einsum("bij,bjk->bik", I_M, dI)
            + jnp.einsum("bij,bjk->bik", dI, I_M)
            - 2.0 * xp)
    dcov = jnp.maximum(dcov, 0.0001)
    dcov = jnp.exp(t) * dcov
    dcov = jnp.sqrt(dcov + 1e-5)
    out = (dcov
           - jnp.einsum("bij,bjk->bik", dcov, I_M) / dim
           - jnp.einsum("bij,bjk->bik", I_M, dcov) / dim
           + jnp.einsum("bij,bjk,bkl->bil", I_M, dcov, I_M) / (dim * dim))
    return out.reshape(B, -1)


if __name__ == "__main__":
    key = jax.random.PRNGKey(0)

    # Small shapes consistent with the module: input_dim=(C, H, W); the forward
    # consumes x of shape (B, C, M) with M = H*W.
    B, C, H, W = 2, 8, 4, 4
    x_nchw = jax.random.normal(key, (B, C, H, W), dtype=jnp.float32)
    x = x_nchw.reshape(B, C, H * W)    # (B, dim, M)

    # Deterministic parameter init, matching __init__:
    # temperature = log(1 / (2 * input_dim[1] * input_dim[2])) as a (1, 1) tensor.
    temperature = jnp.full((1, 1), math.log(1.0 / (2.0 * H * W)), dtype=jnp.float32)

    out = jax.block_until_ready(bdc_forward(x, temperature))

    expected = bdc_reference(x, temperature[0, 0])
    assert out.shape == (B, C * C), out.shape
    assert jnp.allclose(out, expected, atol=1e-4, rtol=1e-4), \
        float(jnp.max(jnp.abs(out - expected)))

    print("KERNEL_OK")
</pallas_src>

<mosaic_0001>
module attributes {stable_mosaic.version = 11 : i64} {
  func.func @bdc_kernel(%arg0: i32, %arg1: memref<1xf32, #tpu.memory_space<smem>>, %arg2: memref<1x8x16xf32, #tpu.memory_space<vmem>>, %arg3: memref<1x8x8xf32, #tpu.memory_space<vmem>>) attributes {dimension_semantics = [#tpu.dimension_semantics<parallel>], iteration_bounds = array<i64: 2>, scalar_prefetch = 1 : i64, scratch_operands = 0 : i64, tpu.core_type = #tpu.core_type<tc>, window_params = [{transform_indices = @transform_0, window_bounds = array<i64: 1, 8, 16>}, {transform_indices = @transform_1, window_bounds = array<i64: 1, 8, 8>}]} {
    %c0 = arith.constant 0 : index
    %c0_0 = arith.constant 0 : index
    %c0_1 = arith.constant 0 : index
    %0 = vector.load %arg2[%c0, %c0_0, %c0_1] : memref<1x8x16xf32, #tpu.memory_space<vmem>>, vector<1x8x16xf32>
    %c0_2 = arith.constant 0 : index
    %1 = memref.load %arg1[%c0_2] : memref<1xf32, #tpu.memory_space<smem>>
    "tpu.trace_start"() <{level = 10 : i32, message = "bdm,bem->bde"}> : () -> ()
    %cst = arith.constant dense<0.000000e+00> : vector<1x8x8xf32>
    %2 = tpu.matmul %0, %0, %cst {dimension_numbers = #tpu.dot_dimension_numbers<[2], [2], [1], [1], [0, 0, 0, 1, 1, 1], [0], [0]>} : vector<1x8x16xf32>, vector<1x8x16xf32>, vector<1x8x8xf32> -> vector<1x8x8xf32>
    "tpu.trace_stop"() : () -> ()
    %3 = arith.mulf %0, %0 : vector<1x8x16xf32>
    %cst_3 = arith.constant dense<0.000000e+00> : vector<1x8xf32>
    %4 = vector.multi_reduction <add>, %3, %cst_3 [2] : vector<1x8x16xf32> to vector<1x8xf32>
    %5 = vector.shape_cast %4 : vector<1x8xf32> to vector<1x8x1xf32>
    %cst_4 = arith.constant dense<0.000000e+00> : vector<1x8xf32>
    %6 = vector.multi_reduction <add>, %3, %cst_4 [2] : vector<1x8x16xf32> to vector<1x8xf32>
    %7 = vector.shape_cast %6 : vector<1x8xf32> to vector<1x1x8xf32>
    %8 = vector.broadcast %5 : vector<1x8x1xf32> to vector<1x8x8xf32>
    %9 = vector.broadcast %7 : vector<1x1x8xf32> to vector<1x8x8xf32>
    %10 = arith.addf %8, %9 : vector<1x8x8xf32>
    %cst_5 = arith.constant 2.000000e+00 : f32
    %11 = vector.broadcast %cst_5 : f32 to vector<1x8x8xf32>
    %12 = arith.mulf %11, %2 : vector<1x8x8xf32>
    %13 = arith.subf %10, %12 : vector<1x8x8xf32>
    %cst_6 = arith.constant 9.99999974E-5 : f32
    %14 = vector.broadcast %cst_6 : f32 to vector<1x8x8xf32>
    %15 = arith.maximumf %13, %14 : vector<1x8x8xf32>
    %16 = vector.broadcast %1 : f32 to vector<1x8x8xf32>
    %17 = arith.mulf %16, %15 : vector<1x8x8xf32>
    %cst_7 = arith.constant 9.99999974E-6 : f32
    %18 = vector.broadcast %cst_7 : f32 to vector<1x8x8xf32>
    %19 = arith.addf %17, %18 : vector<1x8x8xf32>
    %20 = math.sqrt %19 : vector<1x8x8xf32>
    %cst_8 = arith.constant dense<0.000000e+00> : vector<1x8xf32>
    %21 = vector.multi_reduction <add>, %20, %cst_8 [2] : vector<1x8x8xf32> to vector<1x8xf32>
    %22 = vector.shape_cast %21 : vector<1x8xf32> to vector<1x8x1xf32>
    %cst_9 = arith.constant 8.000000e+00 : f32
    %23 = vector.broadcast %cst_9 : f32 to vector<1x8x1xf32>
    %24 = arith.divf %22, %23 : vector<1x8x1xf32>
    %cst_10 = arith.constant dense<0.000000e+00> : vector<1x8xf32>
    %25 = vector.multi_reduction <add>, %20, %cst_10 [2] : vector<1x8x8xf32> to vector<1x8xf32>
    %cst_11 = arith.constant 8.000000e+00 : f32
    %26 = vector.broadcast %cst_11 : f32 to vector<1x8xf32>
    %27 = arith.divf %25, %26 : vector<1x8xf32>
    %28 = vector.shape_cast %27 : vector<1x8xf32> to vector<1x1x8xf32>
    %cst_12 = arith.constant dense<0.000000e+00> : vector<1x1xf32>
    %29 = vector.multi_reduction <add>, %24, %cst_12 [1] : vector<1x8x1xf32> to vector<1x1xf32>
    %30 = vector.shape_cast %29 : vector<1x1xf32> to vector<1x1x1xf32>
    %cst_13 = arith.constant 8.000000e+00 : f32
    %31 = vector.broadcast %cst_13 : f32 to vector<1x1x1xf32>
    %32 = arith.divf %30, %31 : vector<1x1x1xf32>
    %33 = vector.broadcast %24 : vector<1x8x1xf32> to vector<1x8x8xf32>
    %34 = arith.subf %20, %33 : vector<1x8x8xf32>
    %35 = vector.broadcast %28 : vector<1x1x8xf32> to vector<1x8x8xf32>
    %36 = arith.subf %34, %35 : vector<1x8x8xf32>
    %37 = vector.broadcast %32 : vector<1x1x1xf32> to vector<1x8x8xf32>
    %38 = arith.addf %36, %37 : vector<1x8x8xf32>
    %c0_14 = arith.constant 0 : index
    %c0_15 = arith.constant 0 : index
    %c0_16 = arith.constant 0 : index
    %39 = vector.load %arg3[%c0_14, %c0_15, %c0_16] : memref<1x8x8xf32, #tpu.memory_space<vmem>>, vector<1x8x8xf32>
    tpu.vector_store %arg3[%c0_14, %c0_15, %c0_16], %38 {strides = array<i32>} : memref<1x8x8xf32, #tpu.memory_space<vmem>>, vector<1x8x8xf32>,
    return
  }
  func.func @transform_0(%arg0: i32, %arg1: memref<1xf32, #tpu.memory_space<smem>>) -> (i32, i32, i32) {
    %c0_i32 = arith.constant 0 : i32
    %c0_i32_0 = arith.constant 0 : i32
    %c0_i32_1 = arith.constant 0 : i32
    return %arg0, %c0_i32, %c0_i32_0 : i32, i32, i32
  }
  func.func @transform_1(%arg0: i32, %arg1: memref<1xf32, #tpu.memory_space<smem>>) -> (i32, i32, i32) {
    %c0_i32 = arith.constant 0 : i32
    %c0_i32_0 = arith.constant 0 : i32
    %c0_i32_1 = arith.constant 0 : i32
    return %arg0, %c0_i32, %c0_i32_0 : i32, i32, i32
  }
}

</mosaic_0001>

<bundles_post_ra>
// kernel: tpu_custom_call.1
= control target key start
LH: loop header
LB: loop body
LE: loop exit
PB: predicated region body
PF: predicated region fallthrough
CT: control target
= control target key end

     0   :  { %s695_s0 = inlined_call_operand.<no memory space> [shape: f32[1], index: 0, kind: input, shape index: {}]   ;;  %s696_s1 = inlined_call_operand.hbm [shape: f32[2,8,16], index: 1, kind: input, shape index: {}]   ;;  %s697_s2 = inlined_call_operand.hbm [shape: f32[2,8,8], index: 2, kind: output, shape index: {}]  }
   0x1   :  { %7 = sst [smem:[#allocation3]] %s695_s0 }
   0x2   :  { %8 = vsyncpa [#allocation5], 0 }
   0x3   :  { %10 = vsyncpa [#allocation5 + $0x1], 0 }
   0x4   :  { %11 = vsyncpa [#allocation6], 0 }
   0x5   :  { %13 = vsyncpa [#allocation6 + $0x1], 0  ;;  %s548_s11 = smov 0   ;;  %s550_s12 = smov 0  }
   0x6   :  { %s552_s13 = smov 0   ;;  %s554_s14 = smov 0  }
   0x7 LB: > { %s569_s0 = sadd.s32 4294967295, %s524_s14   ;;  %s361_s15 = sadd.s32 4294967294, %s524_s14   ;;  %s524_s14 = sphi %s554_s14, %s714_s14   ;;  %s520_s13 = sphi %s552_s13, %s713_s13   ;;  %s516_s12 = sphi %s550_s12, %s712_s12   ;;  %s512_s11 = sphi %s548_s11, %s711_s11  }
   0x8   : > { %s573_s16 = sadd.s32 1, %s524_s14   ;;  %s26_s17 = sadd.s32 1, %s520_s13 }
   0x9   : > { %s23_s18 = ssub.s32 %s524_s14, %s573_s16  ;;  %p33_p0 = scmp.ne.s32.totalorder %s520_s13, %s516_s12 }
   0xa   : > { %p24_p1 = scmp.eq.s32.totalorder %s23_s18, 0  ;;  %p34_p2 = scmp.eq.s32.totalorder %s524_s14, 0 }
   0xb   : > { %p39_p3 = scmp.ne.s32.totalorder %s516_s12, %s512_s11  ;;  %p40_p4 = scmp.eq.s32.totalorder %s569_s0, 0 }
   0xc   : > { %s585_s19 = scalar_select %p24_p1, %s520_s13, %s26_s17  }
   0xd   : > { %p587_p5 = por %p34_p2, %p33_p0  ;;  %p591_p6 = por %p40_p4, %p39_p3 }
   0xe   : > { %p63_p7 = scmp.eq.s32.totalorder %s569_s0, 1  ;;  %p69_p8 = scmp.eq.s32.totalorder %s361_s15, 1 }
   0xf   : > { %s701_s21 = scalar_select %p591_p6, 1, 0 }
  0x10   : > { %p394_p10 = scmp.lt.s32.totalorder %s524_s14, 2  ;;  %p598_p11 = por %p63_p7, %p33_p0 }
  0x11   : > { %p602_p12 = por %p69_p8, %p39_p3  ;;  %s89_s24 = sand.u32 1, %s520_s13  }
  0x12   : > { %s702_s22 = scalar_select %p598_p11, 1, 0 }
  0x13   : > { %s703_s23 = scalar_select %p602_p12, 1, 0 }
  0x14   : > { %s365_s25 = sshll.u32 %s524_s14, 7  ;;  %s364_s26 = sshll.u32 %s89_s24, 3 }
  0x15   : > { %s611_s29 = scalar_lea.hbm %s696_s1, %s365_s25  ;;  %s93_s30 = scalar_lea.vmem [#allocation4], %s364_s26 }
  0x16   : > { %s100_s3 = sshll.u32 %s93_s30, 4  ;;  %p615_p13 = pnand %p394_p10, %p587_p5  ;;  %s619_s3 = int_to_ptr.vmem [resolvable:$true] %s100_s3 }
  0x17   : > { %s90_s5 = scalar_lea.sflag [#allocation5], %s89_s24  ;;  %s432_s6 = scalar_lea.hbm %s611_s29, 128 }
  0x18   : > { %p433_p2 = scmp.ne.s32.totalorder %s611_s29, %s432_s6  ;;  %p434_p3 = pneg %p615_p13 }
  0x19   : > { %s437_s9 = scalar_lea.hbm %s696_s1, 256  ;;  %p438_p5 = scmp.lt.s32.totalorder %s611_s29, %s696_s1 }
  0x1a   : > { %p435_p4 = pnand %p434_p3, %p433_p2  ;;  %p439_p8 = scmp.lt.s32.totalorder %s437_s9, %s432_s6 }
  0x1c   : > { %p436_p7 = pneg %p435_p4  ;;  %p440_p10 = por %p439_p8, %p438_p5 }
  0x1e   : > { %p441_p9 = pnand %p440_p10, %p436_p7 }
  0x20   : > { %444 = shalt.err (!%p441_p9)
}
  0x21   : > { %s445_s17 = scalar_lea.vmem %s619_s3, 128  ;;  %s526_s18 = smov [#allocation4]  }
  0x22   : > { %p446_p0 = scmp.ne.s32.totalorder %s619_s3, %s445_s17  ;;  %s450_s20 = sshll.u32 %s526_s18, 4  ;;  %s451_s20 = int_to_ptr.vmem [resolvable:$false] %s450_s20 }
  0x23   : > { %s452_s24 = scalar_lea.vmem %s451_s20, 256  ;;  %p453_p4 = scmp.lt.s32.totalorder %s619_s3, %s451_s20 }
  0x24   : > { %p448_p1 = pnand %p446_p0, %p434_p3  ;;  %p454_p12 = scmp.lt.s32.totalorder %s452_s24, %s445_s17 }
  0x26   : > { %p449_p2 = pneg %p448_p1  ;;  %p455_p11 = por %p454_p12, %p453_p4 }
  0x28   : > { %p456_p6 = pnand %p455_p11, %p449_p2 }
  0x2a   : > { %459 = shalt.err (!%p456_p6)
}
  0x2b   : > { %389 = dma.hbm_to_vmem [thread:$0]  (!%p615_p13), %s611_s29, 128, %s619_s3, %s90_s5  }
  0x2c   : > { %p705_p9 = scmp.lt.s32.totalorder %s524_s14, 3  ;;  %p706_p7 = scmp.ge.s32.totalorder %s524_s14, 1 }
  0x2e   : > { %p106_p0 = pnand %p706_p7, %p705_p9 }
  0x2f   : > { %s646_s25 = sand.u32 (!%p106_p0), 1, %s516_s12   ;;  %p707_p6 = scmp.ne.s32.totalorder (!%p106_p0), %s701_s21, 0 }
  0x30   : > { %109 = sbr.rel (%p106_p0) target bundleno = 450 (0x1c2), region = 24  ;;  %s367_s26 = sshll.u32 (!%p106_p0), %s646_s25, 3 }
  0x31   : > { %s112_s27 = scalar_lea.sflag (!%p106_p0), [#allocation5], %s646_s25  ;;  %s115_s28 = scalar_lea.vmem (!%p106_p0), [#allocation4], %s367_s26 }
  0x35   : > { %503 = dma.done.wait (%p707_p6), %s112_s27, 128  }
  0x36   : > { %505 = vsyncadd (%p707_p6), %s112_s27, 4294967168  ;;  %v527_v0 = vmov 0.0   ;;  %vm528_vm0 = vmmov 0   ;;  %vm136_vm1 = vcmask 130048   ;;  %v134_v1 = vld [vmem:[%s115_s28] sm:$0xff]  ;;  %v215_v4 = vlaneseq  ;;  %s135_s29 = sld [smem:[#allocation3]] }
  0x37   : > { %377 = vmatprep.subr.mxu0 %v527_v0  ;;  %379 = vmatprep.mubr.msk.f32.mxu0 %vm528_vm0, %v527_v0  ;;  %v210_v2 = vmul.f32 %v134_v1, %v134_v1  ;;  %vm248_vm3 = vcmask 64512   ;;  %s372_s21 = sshll.u32 %s569_s0, 7  ;;  %s133_s30 = scalar_lea.vmem [#allocation7], %s367_s26 }
  0x38   : > { %378 = vmatpush3.xpose.msk.msra.mxu0 %vm136_vm1, %v134_v1  ;;  %v216_v5 = vand.u32 127, %v215_v4  ;;  %v218_v6 = vshrl.u32 %v215_v4, 7  ;;  %s291_s3 = sshll.u32 %s133_s30, 4  ;;  %s289_s6 = scalar_lea.hbm %s697_s2, %s372_s21  ;;  %s292_s3 = int_to_ptr.vmem [resolvable:$true] %s291_s3 }
  0x39   : > { %v211_v3 = vsel %vm136_vm1, %v210_v2, 0.0  ;;  %s278_s7 = scalar_lea.sflag [#allocation6], %s646_s25  ;;  %s460_s8 = scalar_lea.vmem %s292_s3, 128 }
  0x3a   : > { %212 = vadd.xlane.f32.xlu0 %v211_v3  ;;  %v219_v7 = vsub.s32 %v216_v5, %v218_v6  ;;  %p461_p11 = scmp.ne.s32.totalorder %s292_s3, %s460_s8  ;;  %p708_p12 = scmp.ne.s32.totalorder %s702_s22, 0 }
  0x3b   : > { %380 = vmatmul.mubr.msk.f32.vlgmr.msra.gmra.mxu0 %vm136_vm1, %v134_v1  ;;  %s529_s0 = smov [#allocation7]  }
  0x3c   : > { %v238_v15 = vstv %s135_s29  ;;  %p462_p13 = pnand %p461_p11, %p708_p12  ;;  %s464_s9 = sshll.u32 %s529_s0, 4  ;;  %s465_s9 = int_to_ptr.vmem [resolvable:$false] %s464_s9 }
  0x3d   : > { %s466_s10 = scalar_lea.vmem %s465_s9, 256  ;;  %p467_p3 = scmp.lt.s32.totalorder %s292_s3, %s465_s9 }
  0x3e   : > { %p463_p1 = pneg %p462_p13  ;;  %p468_p5 = scmp.lt.s32.totalorder %s466_s10, %s460_s8 }
  0x40   : > { %p469_p8 = por %p468_p5, %p467_p3 }
  0x42   : > { %p470_p10 = pnand %p469_p8, %p463_p1 }
  0xc3   : > { %v213_v8 = vpop.xlane.xlu0 %212 }
  0xc4   : > { %v220_v9 = vrot.slane %v213_v8, %v219_v7 }
  0xc6   : > { %v234_v11 = vadd.f32 %v220_v9, %v213_v8 }
  0xfb   : > { %v206_v10 = vpop.f32.mrf.mxu0 }
  0xfc   : > { %v235_v12 = vmul.f32 2.0, %v206_v10 }
  0xfd   : > { %v381_v13 = vpop.f32.mrf.mxu0 }
  0xfe   : > { %v236_v14 = vsub.f32 %v234_v11, %v235_v12 }
 0x100   : > { %v237_v16 = vmax.f32 %v236_v14, 0.0001 }
 0x102   : > { %v239_v17 = vmul.f32 %v238_v15, %v237_v16 }
 0x104   : > { %v240_v18 = vadd.f32 1e-05, %v239_v17 }
 0x106   : > { %430 = vrsqrt.f32 %v240_v18  ;;  %vm243_vm2 = vcmp.eq.f32.partialorder %v240_v18, inf  ;;  %v246_v21 = vand.u32 2147483648, %v240_v18  ;;  %vm245_vm4 = vcmp.eq.f32.partialorder %v240_v18, 0.0 }
 0x113   : > { %v431_v19 = vpop.eup %430 }
 0x114   : > { %v242_v20 = vmul.f32 %v431_v19, %v240_v18 }
 0x116   : > { %v244_v22 = vsel %vm243_vm2, %v240_v18, %v242_v20 }
 0x117   : > { %v247_v23 = vsel %vm245_vm4, %v246_v21, %v244_v22 }
 0x118   : > { %v249_v24 = vsel %vm248_vm3, %v247_v23, 0.0 }
 0x119   : > { %250 = vadd.xlane.f32.xlu0 %v249_v24 }
 0x1a2   : > { %v251_v25 = vpop.xlane.xlu0 %250 }
 0x1a3   : > { %v253_v26 = vmul.f32 0.125, %v251_v25 }
 0x1a5   : > { %v254_v27 = vrot.slane %v253_v26, 4  ;;  %v261_v32 = vsub.f32 %v247_v23, %v253_v26  ;;  %v266_v33 = vrot.slane %v253_v26, %v219_v7 }
 0x1a7   : > { %v255_v28 = vadd.f32 %v254_v27, %v253_v26  ;;  %v274_v36 = vsub.f32 %v261_v32, %v266_v33 }
 0x1a9   : > { %v256_v29 = vrot.slane %v255_v28, 2 }
 0x1ab   : > { %v257_v30 = vadd.f32 %v256_v29, %v255_v28 }
 0x1ad   : > { %v258_v31 = vrot.slane %v257_v30, 1 }
 0x1af   : > { %v259_v34 = vadd.f32 %v258_v31, %v257_v30 }
 0x1b1   : > { %v260_v35 = vmul.f32 0.125, %v259_v34 }
 0x1b3   : > { %v275_v37 = vadd.f32 %v274_v36, %v260_v35 }
 0x1b5   : > { %276 = vst.msk [vmem:[%s133_s30] sm:$0xff] %vm248_vm3, %v275_v37 }
 0x1b6   : > { %473 = shalt.err (!%p470_p10)
}
 0x1b7   : > { %s474_s15 = scalar_lea.hbm %s289_s6, 128  ;;  %s478_s20 = scalar_lea.hbm %s697_s2, 256 }
 0x1b8   : > { %p475_p2 = scmp.ne.s32.totalorder %s289_s6, %s474_s15  ;;  %p479_p7 = scmp.lt.s32.totalorder %s289_s6, %s697_s2 }
 0x1b9   : > { %p480_p0 = scmp.lt.s32.totalorder %s478_s20, %s474_s15 }
 0x1ba   : > { %p476_p4 = pnand %p475_p2, %p708_p12 }
 0x1bb   : > { %p481_p6 = por %p480_p0, %p479_p7 }
 0x1bc   : > { %p477_p9 = pneg %p476_p4 }
 0x1be   : > { %p482_p11 = pnand %p481_p6, %p477_p9 }
 0x1c0   : > { %485 = shalt.err (!%p482_p11)
}
 0x1c1   : > { %384 = dma.vmem_to_hbm [thread:$0]  (%p708_p12), %s292_s3, 128, %s289_s6, %s278_s7  }
 0x1c2 PF: > { %s303_s26 = sand.u32 1, %s512_s11   ;;  %p709_p13 = scmp.ne.s32.totalorder %s703_s23, 0 }
 0x1c3   : > { %p710_p1 = scmp.ge.s32.totalorder %s524_s14, 2  ;;  %s304_s27 = scalar_lea.sflag [#allocation6], %s303_s26 }
 0x1c5   : > { %p391_p3 = pnand %p710_p1, %p709_p13 }
 0x1c7   : > { %p392_p5 = pneg %p391_p3 }
 0x1c9   : > { %507 = dma.done.wait (%p392_p5), %s304_s27, 128  }
 0x1ca   : > { %509 = vsyncadd (%p392_p5), %s304_s27, 4294967168  ;;  %p16_p8 = scmp.ge.s32.totalorder %s573_s16, 4   ;;  %s711_s11 = smov %s516_s12 }
 0x1cb   : > { %s712_s12 = smov %s520_s13  ;;  %s713_s13 = smov %s585_s19 }
 0x1cc   : > { %s714_s14 = smov %s573_s16  ;;  %18 = sbr.rel (!%p16_p8) target bundleno = 7 (0x7), region = 69 }
 0x1d1   :  { %309 = vsyncpa [#allocation5], 1 }
 0x1d2   :  { %311 = vsyncpa [#allocation5 + $0x1], 1 }
 0x1d3   :  { %312 = vsyncpa [#allocation6], 1 }
 0x1d4   :  { %314 = vsyncpa [#allocation6 + $0x1], 1 }

</bundles_post_ra>
